<compile_context>
chip_gen: v7x
topology: tpu7x:2x2x1
jax: 0.10.0
libtpu: 0.0.40
codegen_flags: <defaults>
</compile_context>

<pallas_src>
import functools

import jax
import jax.numpy as jnp
from jax import lax
from jax.experimental import pallas as pl
from jax.experimental.pallas import tpu as pltpu


def _round_up(x, m):
    return ((x + m - 1) // m) * m


def _vmem_capacity_bytes():
    """Physical VMEM bytes of the attached TPU; conservative fallback (v7x-sized)."""
    try:
        info = pltpu.get_tpu_info()
        cap = getattr(info, "vmem_capacity_bytes", None)
        if cap:
            return int(cap)
    except Exception:
        pass
    return 64 * 1024 * 1024


def _wmse_partial_kernel(out_ref, tgt_ref, sq_part_ref, cnt_part_ref, *,
                         bc, f, tm, tf, mask_rows, mask_lanes):
    """One (row-block, feature-block) step -> per-row partial (sq_sum, cnt)."""
    i = pl.program_id(0)          # row-block index
    j = pl.program_id(1)          # feature-block index

    o = out_ref[...].astype(jnp.float32)
    t = tgt_ref[...].astype(jnp.float32)

    valid = t > 0.0
    if mask_lanes:
        # Last feature block overhangs F; its out-of-bounds lanes hold garbage,
        # so mask them *before* the validity test / reduction.
        col = j * tf + lax.broadcasted_iota(jnp.int32, (tm, tf), 1)
        valid = jnp.logical_and(valid, col < f)

    diff = jnp.where(valid, o - t, 0.0)
    sq_sum = jnp.sum(diff * diff, axis=-1, keepdims=True)               # (tm, 1)
    cnt = jnp.sum(valid.astype(jnp.float32), axis=-1, keepdims=True)    # (tm, 1)

    if mask_rows:
        # Last row block overhangs BC; discard its garbage rows after the lane
        # reduction (post-reduction masking is far cheaper than a 2-D mask).
        row = i * tm + lax.broadcasted_iota(jnp.int32, (tm, 1), 0)
        keep = row < bc
        sq_sum = jnp.where(keep, sq_sum, 0.0)
        cnt = jnp.where(keep, cnt, 0.0)

    sq_part_ref[...] = sq_sum[None]      # (1, tm, 1)
    cnt_part_ref[...] = cnt[None]        # (1, tm, 1)


def weighted_mse_loss(outputs, targets, reduction="mean", tm=None, tf=None):
    """outputs, targets: [B, C, H, W]. Returns a scalar float32 loss."""
    B, C, H, W = outputs.shape
    assert targets.shape == outputs.shape
    assert targets.dtype == outputs.dtype
    BC = B * C
    F = H * W
    # f32 valid-pixel counting is exact below 2^24 valid pixels per slab.
    assert F < 2 ** 24, "per-(b,c) slab too large for exact f32 counting"

    itemsize = jnp.dtype(outputs.dtype).itemsize
    sublane = max(8, 32 // itemsize)          # 8 (f32), 16 (bf16), 32 (int8/fp8)

    # Generation-aware block / VMEM budget: v5e & v6e have 128 MiB physical
    # VMEM (8 MiB blocks, 64 MiB scoped limit); v7x has 64 MiB (4 / 32 MiB).
    if _vmem_capacity_bytes() >= 100 * 1024 * 1024:
        max_block_bytes = 8 * 1024 * 1024
        vmem_limit = 64 * 1024 * 1024
    else:
        max_block_bytes = 4 * 1024 * 1024
        vmem_limit = 32 * 1024 * 1024

    # Row tile (dtype-aware sublane multiple, clamped to the block budget).
    if tm is not None:
        TM = _round_up(max(int(tm), 1), sublane)
    elif sublane * F * itemsize <= max_block_bytes:
        TM = min(512,
                 max(sublane, (max_block_bytes // (F * itemsize)) // sublane * sublane),
                 _round_up(BC, sublane))
    else:
        TM = sublane

    # Feature tile: full F (exempt from the 128-lane rule) whenever a (TM, F)
    # block fits the budget; otherwise tile F in 128-lane multiples.
    if tf is not None:
        TF = _round_up(max(int(tf), 128), 128)
    elif TM * F * itemsize <= max_block_bytes:
        TF = F
    else:
        TF = max(128, (max_block_bytes // (TM * itemsize)) // 128 * 128)
    if TF >= F:
        TF = F

    G_r = pl.cdiv(BC, TM)
    G_f = pl.cdiv(F, TF)
    mask_rows = (BC % TM) != 0
    mask_lanes = (F % TF) != 0

    # Free reshape (row-major contiguous) — no padding, no extra HBM traffic.
    out_r = outputs.reshape(BC, F)
    tgt_r = targets.reshape(BC, F)

    kernel = functools.partial(
        _wmse_partial_kernel, bc=BC, f=F, tm=TM, tf=TF,
        mask_rows=mask_rows, mask_lanes=mask_lanes)

    cost = pl.CostEstimate(
        flops=6 * BC * F,
        transcendentals=0,
        bytes_accessed=2 * BC * F * itemsize + 2 * G_f * G_r * TM * 4,
    )

    in_spec = pl.BlockSpec((TM, TF), lambda i, j: (i, j))
    part_spec = pl.BlockSpec((1, TM, 1), lambda i, j: (j, i, 0))
    part_shape = jax.ShapeDtypeStruct((G_f, G_r * TM, 1), jnp.float32)

    # TODO(synk): for tiny blocks (<~1 MiB) pipeline_mode=pl.Buffered(3) on the
    # input specs can hide per-step DMA latency (minor win; sweep per shape).
    sq_p, cnt_p = pl.pallas_call(
        kernel,
        out_shape=(part_shape, part_shape),
        grid_spec=pltpu.PrefetchScalarGridSpec(
            num_scalar_prefetch=0,
            grid=(G_r, G_f),
            in_specs=[in_spec, in_spec],
            out_specs=[part_spec, part_spec],
        ),
        compiler_params=pltpu.CompilerParams(
            dimension_semantics=("parallel", "parallel"),
            vmem_limit_bytes=vmem_limit,
        ),
        cost_estimate=cost,
    )(out_r, tgt_r)

    # Tiny O(BC) epilogue: combine feature-block partials, per-row sqrt / mse,
    # then the global weighted reduction (matches the PyTorch loop semantics).
    sq_sum = jnp.sum(sq_p[..., 0], axis=0)       # (G_r*TM,)
    cnt = jnp.sum(cnt_p[..., 0], axis=0)         # (G_r*TM,)
    has_valid = cnt > 0.0
    weight = jnp.sqrt(cnt * (1.0 / F))
    mse = sq_sum / jnp.maximum(cnt, 1.0)
    total_loss = jnp.sum(jnp.where(has_valid, mse * weight, 0.0))
    total_weight = jnp.sum(jnp.where(has_valid, weight, 0.0))

    if reduction == "mean":
        return jnp.where(total_weight > 0.0, total_loss / total_weight, 0.0)
    # 'sum' and 'none' both return the raw accumulated scalar in the reference.
    return jnp.where(total_weight > 0.0, total_loss, 0.0)


def _reference(outputs, targets, reduction="mean"):
    """Pure-JAX reference matching the PyTorch loop semantics."""
    B, C, H, W = outputs.shape
    o = outputs.reshape(B * C, H * W).astype(jnp.float32)
    t = targets.reshape(B * C, H * W).astype(jnp.float32)
    valid = t > 0.0
    cnt = jnp.sum(valid, axis=1).astype(jnp.float32)
    sq = jnp.where(valid, (o - t) ** 2, 0.0)
    sq_sum = jnp.sum(sq, axis=1)
    has = cnt > 0
    weight = jnp.sqrt(cnt / (H * W))
    mse = sq_sum / jnp.maximum(cnt, 1.0)
    total_loss = jnp.sum(jnp.where(has, mse * weight, 0.0))
    total_weight = jnp.sum(jnp.where(has, weight, 0.0))
    if reduction == "mean":
        return jnp.where(total_weight > 0, total_loss / total_weight, 0.0)
    return jnp.where(total_weight > 0, total_loss, 0.0)


if __name__ == "__main__":
    key = jax.random.PRNGKey(0)
    ks = jax.random.split(key, 8)

    # Case 1: aligned shapes (F=256), one fully-invalid slab, both reductions.
    B, C, H, W = 2, 4, 16, 16
    o1 = jax.random.normal(ks[0], (B, C, H, W), dtype=jnp.float32)
    t1 = jax.random.normal(ks[1], (B, C, H, W), dtype=jnp.float32)
    t1 = t1.at[0, 1].set(-1.0)  # skip path: zero valid pixels in this slab
    for red in ("mean", "sum"):
        got = jax.block_until_ready(weighted_mse_loss(o1, t1, reduction=red))
        ref = _reference(o1, t1, reduction=red)
        assert jnp.allclose(got, ref, rtol=1e-5, atol=1e-6), (red, got, ref)

    # Case 2: unaligned shapes (BC=9, F=144): overhang row-block masking, no padding.
    o2 = jax.random.normal(ks[2], (3, 3, 12, 12), dtype=jnp.float32)
    t2 = jax.random.normal(ks[3], (3, 3, 12, 12), dtype=jnp.float32)
    got2 = jax.block_until_ready(weighted_mse_loss(o2, t2))
    ref2 = _reference(o2, t2)
    assert jnp.allclose(got2, ref2, rtol=1e-5, atol=1e-6), (got2, ref2)

    # Case 3: multiple row blocks (tm=8 -> G_r=4), multi-block partial reduction.
    o3 = jax.random.normal(ks[4], (2, 16, 16, 16), dtype=jnp.float32)
    t3 = jax.random.normal(ks[5], (2, 16, 16, 16), dtype=jnp.float32)
    got3 = jax.block_until_ready(weighted_mse_loss(o3, t3, tm=8))
    ref3 = _reference(o3, t3)
    assert jnp.allclose(got3, ref3, rtol=1e-5, atol=1e-6), (got3, ref3)

    # Case 4: forced feature tiling (tf=128 on F=144 -> G_f=2, lane masking)
    # combined with row overhang (BC=4, TM=8).
    o4 = jax.random.normal(ks[6], (2, 2, 12, 12), dtype=jnp.float32)
    t4 = jax.random.normal(ks[7], (2, 2, 12, 12), dtype=jnp.float32)
    got4 = jax.block_until_ready(weighted_mse_loss(o4, t4, tm=8, tf=128))
    ref4 = _reference(o4, t4)
    assert jnp.allclose(got4, ref4, rtol=1e-5, atol=1e-6), (got4, ref4)

    print("KERNEL_OK")
</pallas_src>

<mosaic_0001>
module attributes {stable_mosaic.version = 11 : i64} {
  func.func @_wmse_partial_kernel(%arg0: i32, %arg1: i32, %arg2: memref<8x256xf32, #tpu.memory_space<vmem>>, %arg3: memref<8x256xf32, #tpu.memory_space<vmem>>, %arg4: memref<1x8x1xf32, #tpu.memory_space<vmem>>, %arg5: memref<1x8x1xf32, #tpu.memory_space<vmem>>) attributes {dimension_semantics = [#tpu.dimension_semantics<parallel>, #tpu.dimension_semantics<parallel>], iteration_bounds = array<i64: 1, 1>, scalar_prefetch = 0 : i64, scratch_operands = 0 : i64, tpu.core_type = #tpu.core_type<tc>, window_params = [{transform_indices = @transform_0, window_bounds = array<i64: 8, 256>}, {transform_indices = @transform_1, window_bounds = array<i64: 8, 256>}, {transform_indices = @transform_2, window_bounds = array<i64: 1, 8, 1>}, {transform_indices = @transform_3, window_bounds = array<i64: 1, 8, 1>}]} {
    %c0 = arith.constant 0 : index
    %c0_0 = arith.constant 0 : index
    %0 = vector.load %arg2[%c0, %c0_0] : memref<8x256xf32, #tpu.memory_space<vmem>>, vector<8x256xf32>
    %c0_1 = arith.constant 0 : index
    %c0_2 = arith.constant 0 : index
    %1 = vector.load %arg3[%c0_1, %c0_2] : memref<8x256xf32, #tpu.memory_space<vmem>>, vector<8x256xf32>
    %cst = arith.constant 0.000000e+00 : f32
    %2 = vector.broadcast %cst : f32 to vector<8x256xf32>
    %3 = arith.cmpf ogt, %1, %2 : vector<8x256xf32>
    %4 = arith.subf %0, %1 : vector<8x256xf32>
    %cst_3 = arith.constant 0.000000e+00 : f32
    %5 = vector.broadcast %cst_3 : f32 to vector<8x256xf32>
    %6 = arith.select %3, %4, %5 : vector<8x256xi1>, vector<8x256xf32>
    %7 = arith.mulf %6, %6 : vector<8x256xf32>
    %cst_4 = arith.constant dense<0.000000e+00> : vector<8xf32>
    %8 = vector.multi_reduction <add>, %7, %cst_4 [1] : vector<8x256xf32> to vector<8xf32>
    %9 = vector.shape_cast %8 : vector<8xf32> to vector<8x1xf32>
    %10 = arith.extui %3 : vector<8x256xi1> to vector<8x256xi32>
    %11 = arith.sitofp %10 : vector<8x256xi32> to vector<8x256xf32>
    %cst_5 = arith.constant dense<0.000000e+00> : vector<8xf32>
    %12 = vector.multi_reduction <add>, %11, %cst_5 [1] : vector<8x256xf32> to vector<8xf32>
    %13 = vector.shape_cast %12 : vector<8xf32> to vector<8x1xf32>
    %14 = vector.shape_cast %9 : vector<8x1xf32> to vector<1x8x1xf32>
    %c0_6 = arith.constant 0 : index
    %c0_7 = arith.constant 0 : index
    %c0_8 = arith.constant 0 : index
    %15 = vector.load %arg4[%c0_6, %c0_7, %c0_8] : memref<1x8x1xf32, #tpu.memory_space<vmem>>, vector<1x8x1xf32>
    tpu.vector_store %arg4[%c0_6, %c0_7, %c0_8], %14 {strides = array<i32>} : memref<1x8x1xf32, #tpu.memory_space<vmem>>, vector<1x8x1xf32>,
    %16 = vector.shape_cast %13 : vector<8x1xf32> to vector<1x8x1xf32>
    %c0_9 = arith.constant 0 : index
    %c0_10 = arith.constant 0 : index
    %c0_11 = arith.constant 0 : index
    %17 = vector.load %arg5[%c0_9, %c0_10, %c0_11] : memref<1x8x1xf32, #tpu.memory_space<vmem>>, vector<1x8x1xf32>
    tpu.vector_store %arg5[%c0_9, %c0_10, %c0_11], %16 {strides = array<i32>} : memref<1x8x1xf32, #tpu.memory_space<vmem>>, vector<1x8x1xf32>,
    return
  }
  func.func @transform_0(%arg0: i32, %arg1: i32) -> (i32, i32) {
    %c0_i32 = arith.constant 0 : i32
    return %arg0, %arg1 : i32, i32
  }
  func.func @transform_1(%arg0: i32, %arg1: i32) -> (i32, i32) {
    %c0_i32 = arith.constant 0 : i32
    return %arg0, %arg1 : i32, i32
  }
  func.func @transform_2(%arg0: i32, %arg1: i32) -> (i32, i32, i32) {
    %c0_i32 = arith.constant 0 : i32
    %c0_i32_0 = arith.constant 0 : i32
    return %arg1, %arg0, %c0_i32 : i32, i32, i32
  }
  func.func @transform_3(%arg0: i32, %arg1: i32) -> (i32, i32, i32) {
    %c0_i32 = arith.constant 0 : i32
    %c0_i32_0 = arith.constant 0 : i32
    return %arg1, %arg0, %c0_i32 : i32, i32, i32
  }
}

</mosaic_0001>

<bundles_post_ra>
// kernel: tpu_custom_call.1
= control target key start
LH: loop header
LB: loop body
LE: loop exit
PB: predicated region body
PF: predicated region fallthrough
CT: control target
= control target key end

     0   :  { %9 = vsyncpa [#allocation3], 0  ;;  %s178_s0 = inlined_call_operand.hbm [shape: f32[8,256], index: 0, kind: input, shape index: {}]   ;;  %s179_s1 = inlined_call_operand.hbm [shape: f32[8,256], index: 1, kind: input, shape index: {}]   ;;  %s180_s2 = inlined_call_operand.vmem [shape: f32[1,8,1], index: 2, kind: output, shape index: {0}]   ;;  %s181_s3 = inlined_call_operand.vmem [shape: f32[1,8,1], index: 3, kind: output, shape index: {1}]  }
   0x1   :  { %10 = vsyncpa [#allocation5], 0  ;;  %s125_s12 = smov [#allocation2]   ;;  %s126_s14 = smov [#allocation4]  }
   0x2   :  { %s17_s13 = sshll.u32 %s125_s12, 4  ;;  %s27_s15 = sshll.u32 %s126_s14, 4  ;;  %s18_s13 = int_to_ptr.vmem [resolvable:$true] %s17_s13  ;;  %s28_s15 = int_to_ptr.vmem [resolvable:$true] %s27_s15 }
   0x3   :  { %s77_s18 = scalar_lea.hbm %s178_s0, 256 }
   0x4   :  { %p78_p0 = scmp.ne.s32.totalorder %s178_s0, %s77_s18  ;;  %p81_p1 = scmp.lt.u32.totalorder %s77_s18, %s178_s0 }
   0x6   :  { %p83_p2 = pnand %p81_p1, %p78_p0 }
   0x8   :  { %86 = shalt.err (!%p83_p2)
}
   0x9   :  { %s87_s23 = scalar_lea.vmem %s18_s13, 256  ;;  %p92_p4 = scmp.lt.s32.totalorder %s18_s13, %s18_s13 }
   0xa   :  { %p88_p3 = scmp.ne.s32.totalorder %s18_s13, %s87_s23  ;;  %p93_p5 = scmp.lt.s32.totalorder %s87_s23, %s87_s23 }
   0xc   :  { %p94_p6 = por %p93_p5, %p92_p4 }
   0xe   :  { %p95_p7 = pnand %p94_p6, %p88_p3 }
  0x10   :  { %98 = shalt.err (!%p95_p7)
}
  0x11   :  { %20 = dma.hbm_to_vmem [thread:$0]  %s178_s0, 256, %s18_s13, [#allocation3]  }
  0x12   :  { %s99_s28 = scalar_lea.hbm %s179_s1, 256 }
  0x13   :  { %p100_p8 = scmp.ne.s32.totalorder %s179_s1, %s99_s28  ;;  %p103_p9 = scmp.lt.u32.totalorder %s99_s28, %s179_s1 }
  0x15   :  { %p105_p10 = pnand %p103_p9, %p100_p8 }
  0x17   :  { %108 = shalt.err (!%p105_p10)
}
  0x18   :  { %s109_s6 = scalar_lea.vmem %s28_s15, 256  ;;  %p114_p12 = scmp.lt.s32.totalorder %s28_s15, %s28_s15 }
  0x19   :  { %p110_p11 = scmp.ne.s32.totalorder %s28_s15, %s109_s6  ;;  %p115_p13 = scmp.lt.s32.totalorder %s109_s6, %s109_s6 }
  0x1b   :  { %p116_p0 = por %p115_p13, %p114_p12 }
  0x1d   :  { %p117_p1 = pnand %p116_p0, %p110_p11 }
  0x1f   :  { %120 = shalt.err (!%p117_p1)
}
  0x20   :  { %30 = dma.hbm_to_vmem [thread:$0]  %s179_s1, 256, %s28_s15, [#allocation5]  }
  0x21   :  { %121 = dma.done.wait [#allocation3], 256  }
  0x22   :  { %122 = vsyncadd [#allocation3], 4294967040 }
  0x23   :  { %123 = dma.done.wait [#allocation5], 256  }
  0x24   :  { %124 = vsyncadd [#allocation5], 4294967040  ;;  %v37_v0 = vld [vmem:[#allocation2] sm:$0xff]  ;;  %v38_v1 = vld [vmem:[#allocation2 + $0x8] sm:$0xff]  ;;  %v127_v10 = vmov 0.0   ;;  %vm59_vm2 = vcmask 7168  }
  0x25   :  { %v39_v2 = vld [vmem:[#allocation4] sm:$0xff]  ;;  %v40_v3 = vld [vmem:[#allocation4 + $0x8] sm:$0xff] }
  0x26   :  { %vm41_vm0 = vcmp.gt.f32.partialorder %v39_v2, 0.0  ;;  %v43_v4 = vsub.f32 %v37_v0, %v39_v2  ;;  %vm42_vm1 = vcmp.gt.f32.partialorder %v40_v3, 0.0  ;;  %v44_v5 = vsub.f32 %v38_v1, %v40_v3 }
  0x27   :  { %v72_v11 = vsel %vm41_vm0, 1.0, %v127_v10  ;;  %v73_v12 = vsel %vm42_vm1, 1.0, %v127_v10 }
  0x28   :  { %v45_v6 = vsel %vm41_vm0, %v43_v4, 0.0  ;;  %v46_v7 = vsel %vm42_vm1, %v44_v5, 0.0  ;;  %v56_v14 = vadd.f32 %v73_v12, %v72_v11 }
  0x29   :  { %v47_v8 = vmul.f32 %v45_v6, %v45_v6  ;;  %v48_v9 = vmul.f32 %v46_v7, %v46_v7 }
  0x2b   :  { %v49_v13 = vadd.f32 %v48_v9, %v47_v8 }
  0x2d   :  { %50 = vadd.xlane.f32.xlu0 %v49_v13 }
  0x31   :  { %57 = vadd.xlane.f32.xlu0 %v56_v14 }
  0xba   :  { %v51_v15 = vpop.xlane.xlu0 %50 }
  0xbb   :  { %60 = vst.msk [vmem:[%s180_s2] sm:$0xff] %vm59_vm2, %v51_v15 }
  0xbe   :  { %v58_v16 = vpop.xlane.xlu0 %57 }
  0xbf   :  { %61 = vst.msk [vmem:[%s181_s3] sm:$0xff] %vm59_vm2, %v58_v16 }
  0xc0   :  { %70 = vsyncpa [#allocation3], 1 }
  0xc1   :  { %71 = vsyncpa [#allocation5], 1 }

</bundles_post_ra>
